<compile_context>
chip_gen: v5e
topology: v5e:2x2
jax: 0.10.0
libtpu: 0.0.40
codegen_flags: <defaults>
</compile_context>

<pallas_src>
import math
import numpy as np
import jax
import jax.numpy as jnp
from jax.experimental import pallas as pl
from jax.experimental.pallas import tpu as pltpu

TRIP_COLS = ['tod', 'road', 'road_prop', 'lng', 'lat', 'weekday', 'seq_i', 'seconds']


# --------------------------------------------------------------------------- #
# Kernel: out = x * scale + shift (scale/shift are (1, L) f32, broadcast rows) #
# --------------------------------------------------------------------------- #
def _norm_affine_kernel(x_ref, scale_ref, shift_ref, o_ref):
    x = x_ref[...].astype(jnp.float32)
    o_ref[...] = (x * scale_ref[...] + shift_ref[...]).astype(o_ref.dtype)


def _build_affine(stat, feat_cols, feat_names, norm_type, num_feats):
    """Fold Normalizer._norm_col into per-column (scale, shift); f64 math -> f32."""
    scale = np.ones((num_feats,), dtype=np.float64)
    shift = np.zeros((num_feats,), dtype=np.float64)
    for col, name in zip(feat_cols, feat_names):
        if norm_type == 'zscore':
            std = float(stat['std'][name])
            mean = float(stat['mean'][name])
            if std == 0:
                scale[col] = 0.0
                shift[col] = 0.0
            else:
                scale[col] = 1.0 / std
                shift[col] = -mean / std
        elif norm_type == 'minmax':
            lo = float(stat['min'][name])
            hi = float(stat['max'][name])
            denom = hi - lo
            if denom == 0:
                scale[col] = 0.0
                shift[col] = 0.0
            else:
                scale[col] = 2.0 / denom
                shift[col] = -2.0 * lo / denom - 1.0
        else:
            raise NotImplementedError(norm_type)
    return scale.astype(np.float32), shift.astype(np.float32)


def _tpu_tile_budget():
    """(per-buffer tile bytes, scoped VMEM limit) tuned per TPU generation."""
    try:
        kind = jax.devices()[0].device_kind.lower()
    except Exception:
        kind = ""
    if "v7" in kind:
        # 64 MiB physical VMEM, ~3.2 TB/s HBM: ~5 MiB tiles, 48 MiB scoped limit.
        return 5 * 1024 * 1024, 48 * 1024 * 1024
    if "v6" in kind or "v5" in kind:
        # 128 MiB physical VMEM: ~8 MiB tiles, 64 MiB scoped limit.
        return 8 * 1024 * 1024, 64 * 1024 * 1024
    # Conservative default for unknown generations.
    return 4 * 1024 * 1024, 48 * 1024 * 1024


def normalizer_forward(arr, stat, feat_cols, feat_names=None, norm_type='zscore',
                       donate_input=False):
    """Pallas equivalent of Normalizer.forward. arr: [..., F]."""
    if feat_names is None:
        feat_names = [TRIP_COLS[c] for c in feat_cols]

    # Integer inputs would silently truncate the normalized values on the final
    # cast back to the input dtype; promote to f32 at the wrapper boundary.
    if not jnp.issubdtype(arr.dtype, jnp.floating):
        arr = arr.astype(jnp.float32)

    orig_shape = arr.shape
    F = orig_shape[-1]
    total = int(np.prod(orig_shape))
    itemsize = jnp.dtype(arr.dtype).itemsize
    sublane = 8 * max(1, 4 // itemsize)          # 8 f32 / 16 bf16 / 32 int8,fp8

    # ---- zero-copy 2-D view (rows, lane) ------------------------------------
    lane0 = (F * 128) // math.gcd(F, 128)        # lcm(F, 128): lane-dense width
    if total % lane0 == 0:
        # Fast path: lane-dense, unmasked stores, zero-copy reshape.
        lane = lane0
        while lane * 2 <= 2048 and total % (lane * 2) == 0:
            lane *= 2
    else:
        # Ragged fallback: keep the natural (N, F) view.  Still zero-copy (no
        # pad / slice -> no extra HBM passes); stores are lane-masked if F<128.
        lane = F
    rows = total // lane
    x2d = arr.reshape(rows, lane)                # zero-copy view

    # ---- dtype/generation-aware row tile -------------------------------------
    tile_bytes, vmem_limit = _tpu_tile_budget()
    target_rows = max(sublane, tile_bytes // (lane * itemsize))
    if rows <= target_rows:
        tile_r = rows                            # single full-dim block (legal)
    else:
        tile_r = max(sublane, (target_rows // sublane) * sublane)
        # v7x megacore balance: prefer >= 4 grid steps when there is > 1 tile
        # (per-step overhead stays negligible at these tile sizes).
        while tile_r > sublane and 1 < -(-rows // tile_r) < 4:
            tile_r = max(sublane, ((tile_r // 2) // sublane) * sublane)

    grid = (pl.cdiv(rows, tile_r),)

    # ---- per-lane scale/shift (f32, resident across the grid) ----------------
    scale_c, shift_c = _build_affine(stat, feat_cols, feat_names, norm_type, F)
    scale_row = jnp.asarray(np.tile(scale_c, lane // F)[None, :])   # (1, L) f32
    shift_row = jnp.asarray(np.tile(shift_c, lane // F)[None, :])   # (1, L) f32

    io_aliases = {0: 0} if donate_input else {}

    out2d = pl.pallas_call(
        _norm_affine_kernel,
        out_shape=jax.ShapeDtypeStruct((rows, lane), arr.dtype),
        grid=grid,
        in_specs=[
            pl.BlockSpec((tile_r, lane), lambda i: (i, 0)),   # data (pipelined)
            pl.BlockSpec((1, lane), lambda i: (0, 0)),        # scale (resident)
            pl.BlockSpec((1, lane), lambda i: (0, 0)),        # shift (resident)
        ],
        out_specs=pl.BlockSpec((tile_r, lane), lambda i: (i, 0)),
        compiler_params=pltpu.CompilerParams(
            dimension_semantics=("parallel",),
            vmem_limit_bytes=vmem_limit),
        cost_estimate=pl.CostEstimate(
            flops=2 * total,
            transcendentals=0,
            bytes_accessed=2 * total * itemsize),
        input_output_aliases=io_aliases,
    )(x2d, scale_row, shift_row)

    return out2d.reshape(orig_shape)


# --------------------------------------------------------------------------- #
# NumPy reference mirroring the PyTorch module                                 #
# --------------------------------------------------------------------------- #
def _numpy_reference(arr, stat, feat_cols, feat_names, norm_type='zscore'):
    x = np.copy(np.asarray(arr))
    for col, name in zip(feat_cols, feat_names):
        if norm_type == 'zscore':
            std = stat['std'][name]
            if std == 0:
                x[..., col] = np.zeros_like(x[..., col])
            else:
                x[..., col] = (x[..., col] - stat['mean'][name]) / std
        elif norm_type == 'minmax':
            denom = stat['max'][name] - stat['min'][name]
            if denom == 0:
                x[..., col] = np.zeros_like(x[..., col])
            else:
                x[..., col] = ((x[..., col] - stat['min'][name]) / denom) * 2 - 1
        else:
            raise NotImplementedError(norm_type)
    return x


if __name__ == "__main__":
    key = jax.random.PRNGKey(0)

    # Small shapes: batch=2, seq=8, F = len(TRIP_COLS) = 8
    B, S, F = 2, 8, len(TRIP_COLS)
    arr = jax.random.normal(key, (B, S, F), dtype=jnp.float32) * 5.0 + 2.0

    # Deterministic synthetic statistics (stand-in for the pandas stat frame).
    # TODO(synk): in production the pandas `stat.loc[...]` lookups are folded
    # host-side into (scale, shift); only the affine runs on TPU.
    stat = {
        'mean': {name: 0.5 * (i + 1) for i, name in enumerate(TRIP_COLS)},
        'std':  {name: (0.0 if name == 'weekday' else 1.0 + 0.25 * i)
                 for i, name in enumerate(TRIP_COLS)},
        'min':  {name: -1.0 * (i + 1) for i, name in enumerate(TRIP_COLS)},
        'max':  {name: 1.0 * (i + 1) for i, name in enumerate(TRIP_COLS)},
    }

    # Normalize columns tod, road, lng, lat, weekday, seconds; leave others untouched.
    feat_cols = [0, 1, 3, 4, 5, 7]
    feat_names = [TRIP_COLS[c] for c in feat_cols]

    # zscore path (lane-dense fast path: total=128 divisible by lcm(F,128)=128)
    out = normalizer_forward(arr, stat, feat_cols, feat_names, norm_type='zscore')
    out = jax.block_until_ready(out)
    ref = _numpy_reference(np.asarray(arr), stat, feat_cols, feat_names, 'zscore')
    np.testing.assert_allclose(np.asarray(out), ref, rtol=1e-5, atol=1e-5)

    # minmax path
    out_mm = normalizer_forward(arr, stat, feat_cols, feat_names, norm_type='minmax')
    out_mm = jax.block_until_ready(out_mm)
    ref_mm = _numpy_reference(np.asarray(arr), stat, feat_cols, feat_names, 'minmax')
    np.testing.assert_allclose(np.asarray(out_mm), ref_mm, rtol=1e-5, atol=1e-5)

    # Ragged element count exercises the zero-copy (N, F) fallback (no pad/slice).
    arr_r = jax.random.normal(jax.random.PRNGKey(1), (3, 5, F), dtype=jnp.float32)
    out_r = normalizer_forward(arr_r, stat, feat_cols, feat_names, norm_type='zscore')
    out_r = jax.block_until_ready(out_r)
    ref_r = _numpy_reference(np.asarray(arr_r), stat, feat_cols, feat_names, 'zscore')
    np.testing.assert_allclose(np.asarray(out_r), ref_r, rtol=1e-5, atol=1e-5)

    # bf16 input exercises the dtype-aware tiling / packing path (output is bf16).
    arr_bf = arr.astype(jnp.bfloat16)
    out_bf = normalizer_forward(arr_bf, stat, feat_cols, feat_names, norm_type='zscore')
    out_bf = jax.block_until_ready(out_bf)
    ref_bf = _numpy_reference(np.asarray(arr_bf.astype(jnp.float32)), stat,
                              feat_cols, feat_names, 'zscore')
    np.testing.assert_allclose(np.asarray(out_bf.astype(jnp.float32)), ref_bf,
                               rtol=3e-2, atol=3e-2)

    print("KERNEL_OK")
</pallas_src>

<mosaic_0001>
module attributes {stable_mosaic.version = 11 : i64} {
  func.func @_norm_affine_kernel(%arg0: i32, %arg1: memref<1x128xf32, #tpu.memory_space<vmem>>, %arg2: memref<1x128xf32, #tpu.memory_space<vmem>>, %arg3: memref<1x128xf32, #tpu.memory_space<vmem>>, %arg4: memref<1x128xf32, #tpu.memory_space<vmem>>) attributes {dimension_semantics = [#tpu.dimension_semantics<parallel>], iteration_bounds = array<i64: 1>, scalar_prefetch = 0 : i64, scratch_operands = 0 : i64, tpu.core_type = #tpu.core_type<tc>, window_params = [{transform_indices = @transform_0, window_bounds = array<i64: 1, 128>}, {pipeline_mode = #tpu.pipeline_mode<synchronous>, transform_indices = @transform_1, window_bounds = array<i64: 1, 128>}, {pipeline_mode = #tpu.pipeline_mode<synchronous>, transform_indices = @transform_2, window_bounds = array<i64: 1, 128>}, {transform_indices = @transform_3, window_bounds = array<i64: 1, 128>}]} {
    %c0 = arith.constant 0 : index
    %c0_0 = arith.constant 0 : index
    %0 = vector.load %arg1[%c0, %c0_0] : memref<1x128xf32, #tpu.memory_space<vmem>>, vector<1x128xf32>
    %c0_1 = arith.constant 0 : index
    %c0_2 = arith.constant 0 : index
    %1 = vector.load %arg2[%c0_1, %c0_2] : memref<1x128xf32, #tpu.memory_space<vmem>>, vector<1x128xf32>
    %2 = arith.mulf %0, %1 : vector<1x128xf32>
    %c0_3 = arith.constant 0 : index
    %c0_4 = arith.constant 0 : index
    %3 = vector.load %arg3[%c0_3, %c0_4] : memref<1x128xf32, #tpu.memory_space<vmem>>, vector<1x128xf32>
    %4 = arith.addf %2, %3 : vector<1x128xf32>
    %c0_5 = arith.constant 0 : index
    %c0_6 = arith.constant 0 : index
    %5 = vector.load %arg4[%c0_5, %c0_6] : memref<1x128xf32, #tpu.memory_space<vmem>>, vector<1x128xf32>
    tpu.vector_store %arg4[%c0_5, %c0_6], %4 {strides = array<i32>} : memref<1x128xf32, #tpu.memory_space<vmem>>, vector<1x128xf32>,
    return
  }
  func.func @transform_0(%arg0: i32) -> (i32, i32) {
    %c0_i32 = arith.constant 0 : i32
    %c0_i32_0 = arith.constant 0 : i32
    return %arg0, %c0_i32 : i32, i32
  }
  func.func @transform_1(%arg0: i32) -> (i32, i32) {
    %c0_i32 = arith.constant 0 : i32
    %c0_i32_0 = arith.constant 0 : i32
    %c0_i32_1 = arith.constant 0 : i32
    return %c0_i32, %c0_i32_0 : i32, i32
  }
  func.func @transform_2(%arg0: i32) -> (i32, i32) {
    %c0_i32 = arith.constant 0 : i32
    %c0_i32_0 = arith.constant 0 : i32
    %c0_i32_1 = arith.constant 0 : i32
    return %c0_i32, %c0_i32_0 : i32, i32
  }
  func.func @transform_3(%arg0: i32) -> (i32, i32) {
    %c0_i32 = arith.constant 0 : i32
    %c0_i32_0 = arith.constant 0 : i32
    return %arg0, %c0_i32 : i32, i32
  }
}

</mosaic_0001>

<bundles_post_ra>
// kernel: tpu_custom_call.1
= control target key start
LH: loop header
LB: loop body
LE: loop exit
PB: predicated region body
PF: predicated region fallthrough
CT: control target
= control target key end

     0   :  { %8 = vsyncpa [#allocation3], 0  ;;  %s183_s0 = inlined_call_operand.hbm [shape: f32[1,128], index: 0, kind: input, shape index: {}]   ;;  %s184_s1 = inlined_call_operand.hbm [shape: f32[1,128], index: 1, kind: input, shape index: {}]   ;;  %s185_s2 = inlined_call_operand.vmem [shape: f32[1,128], index: 2, kind: input, shape index: {}]   ;;  %s186_s3 = inlined_call_operand.hbm [shape: f32[1,128], index: 3, kind: output, shape index: {}]  }
   0x1   :  { %9 = vsyncpa [#allocation6], 0 }
   0x2   :  { %10 = vsyncpa [#allocation4], 0  ;;  %s16_s14 = sshll.u32 %s183_s0, 4  ;;  %s148_s15 = smov [#allocation2]   ;;  %s17_s14 = int_to_ptr.hbm [resolvable:$true] %s16_s14 }
   0x3   :  { %s18_s16 = sshll.u32 %s148_s15, 4  ;;  %s27_s19 = sshll.u32 %s184_s1, 4  ;;  %s19_s16 = int_to_ptr.vmem [resolvable:$true] %s18_s16  ;;  %s28_s19 = int_to_ptr.hbm [resolvable:$true] %s27_s19 }
   0x4   :  { %21 = dma.hbm_to_vmem [thread:$0]  %s17_s14, 16, %s19_s16, [#allocation3]  }
   0x5   :  { %s149_s20 = smov [#allocation5]  }
   0x6   :  { %s29_s21 = sshll.u32 %s149_s20, 4  ;;  %s30_s21 = int_to_ptr.vmem [resolvable:$true] %s29_s21 }
   0x7   :  { %32 = dma.hbm_to_vmem [thread:$0]  %s28_s19, 16, %s30_s21, [#allocation6]  }
   0x8   :  { %142 = dma.done.wait [#allocation3], 16  }
   0x9   :  { %143 = vsyncadd [#allocation3], 4294967280 }
   0xa   :  { %144 = dma.done.wait [#allocation6], 16  }
   0xb   :  { %145 = vsyncadd [#allocation6], 4294967280  ;;  %s150_s22 = smov [#allocation7]   ;;  %s56_s25 = sshll.u32 %s186_s3, 4  ;;  %v43_v0 = vld [vmem:[#allocation2] sm:$0x1]  ;;  %s57_s25 = int_to_ptr.hbm [resolvable:$true] %s56_s25 }
   0xc   :  { %s54_s0 = sshll.u32 %s150_s22, 4  ;;  %v44_v1 = vld [vmem:[#allocation5] sm:$0x1]  ;;  %v46_v2 = vld [vmem:[%s185_s2] sm:$0x1]  ;;  %s55_s0 = int_to_ptr.vmem [resolvable:$true] %s54_s0 }
   0xd   :  { %v45_v3 = vmul.f32 %v44_v1, %v43_v0 }
   0xf   :  { %v47_v4 = vadd.f32 %v46_v2, %v45_v3 }
  0x11   :  { %48 = vst [vmem:[#allocation7] sm:$0x1] %v47_v4 }
  0x12   :  { %59 = dma.vmem_to_hbm [thread:$0]  %s55_s0, 16, %s57_s25, [#allocation4]  }
  0x13   :  { %146 = dma.done.wait [#allocation4], 16  }
  0x14   :  { %147 = vsyncadd [#allocation4], 4294967280 }
  0x15   :  { %64 = vsyncpa [#allocation3], 1 }
  0x16   :  { %65 = vsyncpa [#allocation6], 1 }
  0x17   :  { %66 = vsyncpa [#allocation4], 1 }

</bundles_post_ra>
